<compile_context>
chip_gen: v6e
topology: v6e:2x2x1
jax: 0.10.0
libtpu: 0.0.40
codegen_flags: <defaults>
</compile_context>

<pallas_src>
import jax
import jax.numpy as jnp
from jax.experimental import pallas as pl
from jax.experimental.pallas import tpu as pltpu


def _pwconv_kernel(w_ref, x_ref, o_ref):
    """out[b, co, p] = sum_ci w[co, ci] * x[b, ci, p] for one (batch, pixel) tile.

    w_ref: (C_out, C_in) float32 in SMEM (read as scalars).
    x_ref: (B_blk, C_in,  T) in VMEM, pixels on the lane axis.
    o_ref: (B_blk, C_out, T) in VMEM.
    """
    c_out, c_in = w_ref.shape
    # Load each input channel once (lane-dense (B_blk, T) slabs) and reuse it
    # across all output channels.
    xs = [x_ref[:, ci, :].astype(jnp.float32) for ci in range(c_in)]
    for co in range(c_out):
        acc = w_ref[co, 0] * xs[0]
        for ci in range(1, c_in):
            acc = acc + w_ref[co, ci] * xs[ci]
        o_ref[:, co, :] = acc.astype(o_ref.dtype)


def _choose_tiles(n: int, hw: int, pixels_per_step: int):
    """Pick (batch_block, pixel_tile) so each grid step moves ~pixels_per_step pixels."""
    if hw >= pixels_per_step:
        # Large images: one batch element per step, tile the pixel (lane) axis
        # with a multiple of 128 (lane width).
        t = max(128, (pixels_per_step // 128) * 128)
        b_blk = 1
    else:
        # Small images: take the full pixel axis (block dim == array dim is
        # always legal) and amortize the per-step overhead over batch.
        t = hw
        b_blk = max(1, min(n, pixels_per_step // max(hw, 1)))
    return b_blk, t


def pwconv_1x1(x_nchw: jax.Array, weight_oi11: jax.Array, *,
               pixels_per_step: int = 64 * 1024) -> jax.Array:
    """1x1 conv, stride 1, no padding, no bias.

    x: (N, C_in, H, W), weight: (C_out, C_in, 1, 1) -> (N, C_out, H, W).
    """
    n, c_in, h, w = x_nchw.shape
    c_out = weight_oi11.shape[0]
    assert weight_oi11.shape == (c_out, c_in, 1, 1)

    hw = h * w
    b_blk, t = _choose_tiles(n, hw, pixels_per_step)

    # NCHW -> (N, C, H*W): free reshape, no data movement, no pad.
    x = x_nchw.reshape(n, c_in, hw)
    # Weight as 32-bit scalars for SMEM.
    w_mat = weight_oi11[:, :, 0, 0].astype(jnp.float32)

    grid = (pl.cdiv(n, b_blk), pl.cdiv(hw, t))

    out = pl.pallas_call(
        _pwconv_kernel,
        out_shape=jax.ShapeDtypeStruct((n, c_out, hw), x_nchw.dtype),
        grid_spec=pltpu.PrefetchScalarGridSpec(
            num_scalar_prefetch=0,
            grid=grid,
            in_specs=[
                # Tiny 1x1-conv weight: resident in SMEM, read as scalars.
                pl.BlockSpec(memory_space=pltpu.MemorySpace.SMEM),
                # Pixel stream: (B_blk, C_in, T), pixels on the lane axis.
                pl.BlockSpec((b_blk, c_in, t), lambda b, p: (b, 0, p)),
            ],
            out_specs=pl.BlockSpec((b_blk, c_out, t), lambda b, p: (b, 0, p)),
        ),
        compiler_params=pltpu.CompilerParams(
            # Both axes are independent -> v7x's two TensorCores can share them.
            dimension_semantics=("parallel", "parallel"),
        ),
    )(w_mat, x)

    return out.reshape(n, c_out, h, w)


def cdilated_forward(x_nchw: jax.Array, params: dict) -> jax.Array:
    # dwconv output is overwritten in the reference forward -> only pwconv matters.
    # This only holds (shape-wise) when nIn == nOut, as in any working instantiation.
    # TODO(synk): if the reference module is ever fixed to actually use dwconv/conv,
    # this forward must be extended accordingly.
    return pwconv_1x1(x_nchw, params["pwconv_weight"])


def init_params(nIn: int, nOut: int, kSize: int, key: jax.Array) -> dict:
    """Deterministic synthetic parameter init matching the module's shapes."""
    k_conv, k_dw, k_pw = jax.random.split(key, 3)
    return {
        # conv / dwconv are unused in the forward pass but initialized for shape parity
        "conv_weight": jax.random.normal(k_conv, (nOut, nIn, kSize, kSize), jnp.float32) * 0.05,
        "dwconv_weight": jax.random.normal(k_dw, (nOut, nIn // nOut, kSize, kSize), jnp.float32) * 0.05,
        "pwconv_weight": jax.random.normal(k_pw, (nOut, nOut, 1, 1), jnp.float32) * 0.05,
    }


if __name__ == "__main__":
    key = jax.random.PRNGKey(0)
    k_params, k_x, k_x2 = jax.random.split(key, 3)

    nIn = nOut = 4   # must be equal for the reference forward to typecheck
    kSize = 3
    N, H, W = 2, 16, 16

    params = init_params(nIn, nOut, kSize, k_params)
    w2d = params["pwconv_weight"][:, :, 0, 0]

    # --- Main small test case (default tiling: whole image, batch-blocked) ---
    x = jax.random.normal(k_x, (N, nIn, H, W), jnp.float32)
    out = cdilated_forward(x, params)
    out = jax.block_until_ready(out)
    ref = jnp.einsum("nihw,oi->nohw", x, w2d)
    assert out.shape == (N, nOut, H, W)
    assert jnp.allclose(out, ref, atol=1e-5, rtol=1e-5)

    # --- Ragged-shape checks: exercise partial last blocks (no host pad/slice) ---
    x2 = jax.random.normal(k_x2, (3, nIn, 12, 20), jnp.float32)   # H*W = 240
    ref2 = jnp.einsum("nihw,oi->nohw", x2, w2d)
    # (a) pixel axis tiled in 128s -> 2 pixel tiles, last one partial (112 valid)
    out2a = jax.block_until_ready(
        pwconv_1x1(x2, params["pwconv_weight"], pixels_per_step=128))
    # (b) batch-blocked (b_blk=2 over N=3) -> partial last batch block
    out2b = jax.block_until_ready(
        pwconv_1x1(x2, params["pwconv_weight"], pixels_per_step=512))
    assert jnp.allclose(out2a, ref2, atol=1e-5, rtol=1e-5)
    assert jnp.allclose(out2b, ref2, atol=1e-5, rtol=1e-5)

    print("KERNEL_OK")
</pallas_src>

<mosaic_0001>
module attributes {stable_mosaic.version = 11 : i64} {
  func.func @_pwconv_kernel(%arg0: i32, %arg1: i32, %arg2: memref<4x4xf32, #tpu.memory_space<smem>>, %arg3: memref<2x4x256xf32, #tpu.memory_space<vmem>>, %arg4: memref<2x4x256xf32, #tpu.memory_space<vmem>>) attributes {dimension_semantics = [#tpu.dimension_semantics<parallel>, #tpu.dimension_semantics<parallel>], iteration_bounds = array<i64: 1, 1>, scalar_prefetch = 0 : i64, scratch_operands = 0 : i64, tpu.core_type = #tpu.core_type<tc>, window_params = [{transform_indices = @transform_0, window_bounds = array<i64: 4, 4>}, {transform_indices = @transform_1, window_bounds = array<i64: 2, 4, 256>}, {transform_indices = @transform_2, window_bounds = array<i64: 2, 4, 256>}]} {
    %c0 = arith.constant 0 : index
    %c0_0 = arith.constant 0 : index
    %c0_1 = arith.constant 0 : index
    %0 = vector.load %arg3[%c0, %c0_0, %c0_1] : memref<2x4x256xf32, #tpu.memory_space<vmem>>, vector<2x1x256xf32>
    %1 = vector.shape_cast %0 : vector<2x1x256xf32> to vector<2x256xf32>
    %c0_2 = arith.constant 0 : index
    %c1 = arith.constant 1 : index
    %c0_3 = arith.constant 0 : index
    %2 = vector.load %arg3[%c0_2, %c1, %c0_3] : memref<2x4x256xf32, #tpu.memory_space<vmem>>, vector<2x1x256xf32>
    %3 = vector.shape_cast %2 : vector<2x1x256xf32> to vector<2x256xf32>
    %c0_4 = arith.constant 0 : index
    %c2 = arith.constant 2 : index
    %c0_5 = arith.constant 0 : index
    %4 = vector.load %arg3[%c0_4, %c2, %c0_5] : memref<2x4x256xf32, #tpu.memory_space<vmem>>, vector<2x1x256xf32>
    %5 = vector.shape_cast %4 : vector<2x1x256xf32> to vector<2x256xf32>
    %c0_6 = arith.constant 0 : index
    %c3 = arith.constant 3 : index
    %c0_7 = arith.constant 0 : index
    %6 = vector.load %arg3[%c0_6, %c3, %c0_7] : memref<2x4x256xf32, #tpu.memory_space<vmem>>, vector<2x1x256xf32>
    %7 = vector.shape_cast %6 : vector<2x1x256xf32> to vector<2x256xf32>
    %c0_8 = arith.constant 0 : index
    %c0_9 = arith.constant 0 : index
    %8 = memref.load %arg2[%c0_8, %c0_9] : memref<4x4xf32, #tpu.memory_space<smem>>
    %9 = vector.broadcast %8 : f32 to vector<2x256xf32>
    %10 = arith.mulf %9, %1 : vector<2x256xf32>
    %c0_10 = arith.constant 0 : index
    %c1_11 = arith.constant 1 : index
    %11 = memref.load %arg2[%c0_10, %c1_11] : memref<4x4xf32, #tpu.memory_space<smem>>
    %12 = vector.broadcast %11 : f32 to vector<2x256xf32>
    %13 = arith.mulf %12, %3 : vector<2x256xf32>
    %14 = arith.addf %10, %13 : vector<2x256xf32>
    %c0_12 = arith.constant 0 : index
    %c2_13 = arith.constant 2 : index
    %15 = memref.load %arg2[%c0_12, %c2_13] : memref<4x4xf32, #tpu.memory_space<smem>>
    %16 = vector.broadcast %15 : f32 to vector<2x256xf32>
    %17 = arith.mulf %16, %5 : vector<2x256xf32>
    %18 = arith.addf %14, %17 : vector<2x256xf32>
    %c0_14 = arith.constant 0 : index
    %c3_15 = arith.constant 3 : index
    %19 = memref.load %arg2[%c0_14, %c3_15] : memref<4x4xf32, #tpu.memory_space<smem>>
    %20 = vector.broadcast %19 : f32 to vector<2x256xf32>
    %21 = arith.mulf %20, %7 : vector<2x256xf32>
    %22 = arith.addf %18, %21 : vector<2x256xf32>
    %c0_16 = arith.constant 0 : index
    %c0_17 = arith.constant 0 : index
    %c0_18 = arith.constant 0 : index
    %23 = vector.load %arg4[%c0_16, %c0_17, %c0_18] : memref<2x4x256xf32, #tpu.memory_space<vmem>>, vector<2x1x256xf32>
    %24 = vector.shape_cast %23 : vector<2x1x256xf32> to vector<2x256xf32>
    %25 = vector.shape_cast %22 : vector<2x256xf32> to vector<2x1x256xf32>
    tpu.vector_store %arg4[%c0_16, %c0_17, %c0_18], %25 {strides = array<i32>} : memref<2x4x256xf32, #tpu.memory_space<vmem>>, vector<2x1x256xf32>,
    %c1_19 = arith.constant 1 : index
    %c0_20 = arith.constant 0 : index
    %26 = memref.load %arg2[%c1_19, %c0_20] : memref<4x4xf32, #tpu.memory_space<smem>>
    %27 = vector.broadcast %26 : f32 to vector<2x256xf32>
    %28 = arith.mulf %27, %1 : vector<2x256xf32>
    %c1_21 = arith.constant 1 : index
    %c1_22 = arith.constant 1 : index
    %29 = memref.load %arg2[%c1_21, %c1_22] : memref<4x4xf32, #tpu.memory_space<smem>>
    %30 = vector.broadcast %29 : f32 to vector<2x256xf32>
    %31 = arith.mulf %30, %3 : vector<2x256xf32>
    %32 = arith.addf %28, %31 : vector<2x256xf32>
    %c1_23 = arith.constant 1 : index
    %c2_24 = arith.constant 2 : index
    %33 = memref.load %arg2[%c1_23, %c2_24] : memref<4x4xf32, #tpu.memory_space<smem>>
    %34 = vector.broadcast %33 : f32 to vector<2x256xf32>
    %35 = arith.mulf %34, %5 : vector<2x256xf32>
    %36 = arith.addf %32, %35 : vector<2x256xf32>
    %c1_25 = arith.constant 1 : index
    %c3_26 = arith.constant 3 : index
    %37 = memref.load %arg2[%c1_25, %c3_26] : memref<4x4xf32, #tpu.memory_space<smem>>
    %38 = vector.broadcast %37 : f32 to vector<2x256xf32>
    %39 = arith.mulf %38, %7 : vector<2x256xf32>
    %40 = arith.addf %36, %39 : vector<2x256xf32>
    %c0_27 = arith.constant 0 : index
    %c1_28 = arith.constant 1 : index
    %c0_29 = arith.constant 0 : index
    %41 = vector.load %arg4[%c0_27, %c1_28, %c0_29] : memref<2x4x256xf32, #tpu.memory_space<vmem>>, vector<2x1x256xf32>
    %42 = vector.shape_cast %41 : vector<2x1x256xf32> to vector<2x256xf32>
    %43 = vector.shape_cast %40 : vector<2x256xf32> to vector<2x1x256xf32>
    tpu.vector_store %arg4[%c0_27, %c1_28, %c0_29], %43 {strides = array<i32>} : memref<2x4x256xf32, #tpu.memory_space<vmem>>, vector<2x1x256xf32>,
    %c2_30 = arith.constant 2 : index
    %c0_31 = arith.constant 0 : index
    %44 = memref.load %arg2[%c2_30, %c0_31] : memref<4x4xf32, #tpu.memory_space<smem>>
    %45 = vector.broadcast %44 : f32 to vector<2x256xf32>
    %46 = arith.mulf %45, %1 : vector<2x256xf32>
    %c2_32 = arith.constant 2 : index
    %c1_33 = arith.constant 1 : index
    %47 = memref.load %arg2[%c2_32, %c1_33] : memref<4x4xf32, #tpu.memory_space<smem>>
    %48 = vector.broadcast %47 : f32 to vector<2x256xf32>
    %49 = arith.mulf %48, %3 : vector<2x256xf32>
    %50 = arith.addf %46, %49 : vector<2x256xf32>
    %c2_34 = arith.constant 2 : index
    %c2_35 = arith.constant 2 : index
    %51 = memref.load %arg2[%c2_34, %c2_35] : memref<4x4xf32, #tpu.memory_space<smem>>
    %52 = vector.broadcast %51 : f32 to vector<2x256xf32>
    %53 = arith.mulf %52, %5 : vector<2x256xf32>
    %54 = arith.addf %50, %53 : vector<2x256xf32>
    %c2_36 = arith.constant 2 : index
    %c3_37 = arith.constant 3 : index
    %55 = memref.load %arg2[%c2_36, %c3_37] : memref<4x4xf32, #tpu.memory_space<smem>>
    %56 = vector.broadcast %55 : f32 to vector<2x256xf32>
    %57 = arith.mulf %56, %7 : vector<2x256xf32>
    %58 = arith.addf %54, %57 : vector<2x256xf32>
    %c0_38 = arith.constant 0 : index
    %c2_39 = arith.constant 2 : index
    %c0_40 = arith.constant 0 : index
    %59 = vector.load %arg4[%c0_38, %c2_39, %c0_40] : memref<2x4x256xf32, #tpu.memory_space<vmem>>, vector<2x1x256xf32>
    %60 = vector.shape_cast %59 : vector<2x1x256xf32> to vector<2x256xf32>
    %61 = vector.shape_cast %58 : vector<2x256xf32> to vector<2x1x256xf32>
    tpu.vector_store %arg4[%c0_38, %c2_39, %c0_40], %61 {strides = array<i32>} : memref<2x4x256xf32, #tpu.memory_space<vmem>>, vector<2x1x256xf32>,
    %c3_41 = arith.constant 3 : index
    %c0_42 = arith.constant 0 : index
    %62 = memref.load %arg2[%c3_41, %c0_42] : memref<4x4xf32, #tpu.memory_space<smem>>
    %63 = vector.broadcast %62 : f32 to vector<2x256xf32>
    %64 = arith.mulf %63, %1 : vector<2x256xf32>
    %c3_43 = arith.constant 3 : index
    %c1_44 = arith.constant 1 : index
    %65 = memref.load %arg2[%c3_43, %c1_44] : memref<4x4xf32, #tpu.memory_space<smem>>
    %66 = vector.broadcast %65 : f32 to vector<2x256xf32>
    %67 = arith.mulf %66, %3 : vector<2x256xf32>
    %68 = arith.addf %64, %67 : vector<2x256xf32>
    %c3_45 = arith.constant 3 : index
    %c2_46 = arith.constant 2 : index
    %69 = memref.load %arg2[%c3_45, %c2_46] : memref<4x4xf32, #tpu.memory_space<smem>>
    %70 = vector.broadcast %69 : f32 to vector<2x256xf32>
    %71 = arith.mulf %70, %5 : vector<2x256xf32>
    %72 = arith.addf %68, %71 : vector<2x256xf32>
    %c3_47 = arith.constant 3 : index
    %c3_48 = arith.constant 3 : index
    %73 = memref.load %arg2[%c3_47, %c3_48] : memref<4x4xf32, #tpu.memory_space<smem>>
    %74 = vector.broadcast %73 : f32 to vector<2x256xf32>
    %75 = arith.mulf %74, %7 : vector<2x256xf32>
    %76 = arith.addf %72, %75 : vector<2x256xf32>
    %c0_49 = arith.constant 0 : index
    %c3_50 = arith.constant 3 : index
    %c0_51 = arith.constant 0 : index
    %77 = vector.load %arg4[%c0_49, %c3_50, %c0_51] : memref<2x4x256xf32, #tpu.memory_space<vmem>>, vector<2x1x256xf32>
    %78 = vector.shape_cast %77 : vector<2x1x256xf32> to vector<2x256xf32>
    %79 = vector.shape_cast %76 : vector<2x256xf32> to vector<2x1x256xf32>
    tpu.vector_store %arg4[%c0_49, %c3_50, %c0_51], %79 {strides = array<i32>} : memref<2x4x256xf32, #tpu.memory_space<vmem>>, vector<2x1x256xf32>,
    return
  }
  func.func @transform_0(%arg0: i32, %arg1: i32) -> (i32, i32) {
    %c0_i32 = arith.constant 0 : i32
    %c0_i32_0 = arith.constant 0 : i32
    %c0_i32_1 = arith.constant 0 : i32
    return %c0_i32, %c0_i32_0 : i32, i32
  }
  func.func @transform_1(%arg0: i32, %arg1: i32) -> (i32, i32, i32) {
    %c0_i32 = arith.constant 0 : i32
    %c0_i32_0 = arith.constant 0 : i32
    return %arg0, %c0_i32, %arg1 : i32, i32, i32
  }
  func.func @transform_2(%arg0: i32, %arg1: i32) -> (i32, i32, i32) {
    %c0_i32 = arith.constant 0 : i32
    %c0_i32_0 = arith.constant 0 : i32
    return %arg0, %c0_i32, %arg1 : i32, i32, i32
  }
}

</mosaic_0001>

<bundles_post_ra>
// kernel: tpu_custom_call.1
= control target key start
LH: loop header
LB: loop body
LE: loop exit
PB: predicated region body
PF: predicated region fallthrough
CT: control target
= control target key end

     0   :  { %7 = vsyncpa [#allocation5], 0  ;;  %s390_s0 = inlined_call_operand.hbm [shape: f32[4,4], index: 0, kind: input, shape index: {}]   ;;  %s391_s1 = inlined_call_operand.hbm [shape: f32[2,4,256], index: 1, kind: input, shape index: {}]   ;;  %s392_s2 = inlined_call_operand.hbm [shape: f32[2,4,256], index: 2, kind: output, shape index: {}]  }
   0x1   :  { %8 = vsyncpa [#allocation3], 0 }
   0x2   :  { %9 = vsyncpa [#allocation4], 0  ;;  %s251_s9 = smov [#allocation2]   ;;  %s252_s12 = smov [#allocation6]  }
   0x3   :  { %17 = dma.hbm_to_smem %s390_s0, 64, %s251_s9, [#allocation5]  }
   0x4   :  { %s23_s13 = sshll.u32 %s252_s12, 4  ;;  %s24_s13 = int_to_ptr.vmem [resolvable:$true] %s23_s13 }
   0x5   :  { %s213_s14 = scalar_lea.vmem %s24_s13, 256  ;;  %p218_p1 = scmp.lt.s32.totalorder %s24_s13, %s24_s13 }
   0x6   :  { %p214_p0 = scmp.ne.s32.totalorder %s24_s13, %s213_s14  ;;  %p219_p2 = scmp.lt.s32.totalorder %s213_s14, %s213_s14 }
   0x8   :  { %p220_p3 = por %p219_p2, %p218_p1 }
   0xa   :  { %p221_p4 = pnand %p220_p3, %p214_p0 }
   0xc   :  { %224 = shalt.err (!%p221_p4)
}
   0xd   :  { %s253_s15 = smov 128   ;;  %s254_s16 = smov 8  }
   0xe   :  { %29 = dma.hbm_to_vmem [thread:$0]  %s391_s1, 256, %s24_s13, [#allocation3], %s253_s15, %s253_s15, %s254_s16  }
   0xf   :  { %245 = dma.done.wait [#allocation5], 64  }
  0x10   :  { %246 = vsyncadd [#allocation5], 4294967232 }
  0x11   :  { %247 = dma.done.wait [#allocation3], 256  }
  0x12   :  { %248 = vsyncadd [#allocation3], 4294967040 }
  0x13   :  { %36 = sfence }
  0x14   :  { %s52_s0 = sld [smem:[#allocation2]]  ;;  %v280_v0 = vld [vmem:[#allocation6] ss:$4 sm:$0x3]  ;;  %v74_v10 = vlaneseq  ;;  %s255_s5 = smov [#allocation7]  }
  0x15   :  { %s177_s19 = sld [smem:[#allocation2 + $0x1]]  ;;  %v282_v1 = vld [vmem:[#allocation6 + $0x1] ss:$4 sm:$0x3]  ;;  %s164_s6 = sshll.u32 %s255_s5, 4  ;;  %s165_s6 = int_to_ptr.vmem [resolvable:$true] %s164_s6 }
  0x16   :  { %s178_s20 = sld [smem:[#allocation2 + $0x2]]  ;;  %v284_v2 = vld [vmem:[#allocation6 + $0x2] ss:$4 sm:$0x3]  ;;  %vm318_vm0 = vcmp.lt.s32.totalorder %v74_v10, 256  ;;  %s225_s7 = scalar_lea.vmem %s165_s6, 256 }
  0x17   :  { %s179_s21 = sld [smem:[#allocation2 + $0x3]]  ;;  %v286_v3 = vld [vmem:[#allocation6 + $0x8] ss:$4 sm:$0x3]  ;;  %p226_p5 = scmp.ne.s32.totalorder %s165_s6, %s225_s7 }
  0x18   :  { %s288_s22 = sld [smem:[#allocation2 + $0x80]]  ;;  %v290_v4 = vld [vmem:[#allocation6 + $0x3] ss:$4 sm:$0x3]  ;;  %p230_p6 = scmp.lt.s32.totalorder %s165_s6, %s165_s6 }
  0x19   :  { %v292_v5 = vld [vmem:[#allocation6 + $0x9] ss:$4 sm:$0x3]  ;;  %s294_s1 = sld [smem:[#allocation2 + $0x81]]  ;;  %p231_p7 = scmp.lt.s32.totalorder %s225_s7, %s225_s7 }
  0x1a   :  { %v53_v6 = vstv %s52_s0  ;;  %v296_v7 = vld [vmem:[#allocation6 + $0xa] ss:$4 sm:$0x3]  ;;  %s298_s23 = sld [smem:[#allocation2 + $0x82]] }
  0x1b   :  { %v54_v8 = vmul.f32 %v53_v6, %v280_v0  ;;  %v57_v9 = vstv %s177_s19  ;;  %v301_v11 = vld [vmem:[#allocation6 + $0xb] ss:$4 sm:$0x3]  ;;  %v55_v12 = vmul.f32 %v53_v6, %v286_v3  ;;  %s304_s24 = sld [smem:[#allocation2 + $0x83]]  ;;  %p232_p8 = por %p231_p7, %p230_p6 }
  0x1c   :  { %v58_v13 = vmul.f32 %v57_v9, %v282_v1  ;;  %v63_v14 = vstv %s178_s20  ;;  %v59_v15 = vmul.f32 %v57_v9, %v292_v5  ;;  %s308_s25 = sld [smem:[#allocation2 + $0x100]] }
  0x1d   :  { %v64_v16 = vmul.f32 %v63_v14, %v284_v2  ;;  %v69_v17 = vstv %s179_s21  ;;  %v65_v18 = vmul.f32 %v63_v14, %v296_v7  ;;  %s312_s26 = sld [smem:[#allocation2 + $0x101]]  ;;  %p233_p9 = pnand %p232_p8, %p226_p5 }
  0x1e   :  { %v60_v19 = vadd.f32 %v58_v13, %v54_v8  ;;  %v70_v20 = vmul.f32 %v69_v17, %v290_v4  ;;  %v61_v21 = vadd.f32 %v59_v15, %v55_v12  ;;  %v71_v22 = vmul.f32 %v69_v17, %v301_v11  ;;  %s316_s27 = sld [smem:[#allocation2 + $0x102]] }
  0x1f   :  { %v82_v24 = vstv %s288_s22  ;;  %v86_v25 = vstv %s294_s1  ;;  %s324_s28 = sld [smem:[#allocation2 + $0x103]] }
  0x20   :  { %v66_v26 = vadd.f32 %v64_v16, %v60_v19  ;;  %v67_v27 = vadd.f32 %v65_v18, %v61_v21  ;;  %v83_v28 = vmul.f32 %v82_v24, %v280_v0  ;;  %v87_v29 = vmul.f32 %v86_v25, %v282_v1  ;;  %s328_s29 = sld [smem:[#allocation2 + $0x180]] }
  0x21   :  { %v92_v30 = vstv %s298_s23  ;;  %v98_v31 = vstv %s304_s24  ;;  %v84_v32 = vmul.f32 %v82_v24, %v286_v3  ;;  %v88_v33 = vmul.f32 %v86_v25, %v292_v5  ;;  %s334_s30 = sld [smem:[#allocation2 + $0x181]] }
  0x22   :  { %v72_v34 = vadd.f32 %v70_v20, %v66_v26  ;;  %v73_v35 = vadd.f32 %v71_v22, %v67_v27  ;;  %v89_v36 = vadd.f32 %v87_v29, %v83_v28  ;;  %v93_v37 = vmul.f32 %v92_v30, %v284_v2  ;;  %s337_s3 = sld [smem:[#allocation2 + $0x182]] }
  0x23   :  { %v99_v38 = vmul.f32 %v98_v31, %v290_v4  ;;  %v90_v39 = vadd.f32 %v88_v33, %v84_v32  ;;  %v94_v40 = vmul.f32 %v92_v30, %v296_v7  ;;  %v100_v41 = vmul.f32 %v98_v31, %v301_v11  ;;  %s342_s4 = sld [smem:[#allocation2 + $0x183]] }
  0x24   :  { %78 = vst.msk [vmem:[#allocation7] ss:$4 sm:$0x3] %vm318_vm0, %v72_v34  ;;  %80 = vst.msk [vmem:[#allocation7 + $0x8] ss:$4 sm:$0x3] %vm318_vm0, %v73_v35  ;;  %v95_v42 = vadd.f32 %v93_v37, %v89_v36  ;;  %v108_v43 = vstv %s308_s25  ;;  %v112_v44 = vstv %s312_s26  ;;  %v118_v45 = vstv %s316_s27 }
  0x25   :  { %v96_v46 = vadd.f32 %v94_v40, %v90_v39  ;;  %v109_v47 = vmul.f32 %v108_v43, %v280_v0  ;;  %v113_v48 = vmul.f32 %v112_v44, %v282_v1  ;;  %v119_v49 = vmul.f32 %v118_v45, %v284_v2 }
  0x26   :  { %v101_v50 = vadd.f32 %v99_v38, %v95_v42  ;;  %v124_v51 = vstv %s324_s28  ;;  %v110_v52 = vmul.f32 %v108_v43, %v286_v3  ;;  %v114_v53 = vmul.f32 %v112_v44, %v292_v5 }
  0x27   :  { %v102_v54 = vadd.f32 %v100_v41, %v96_v46  ;;  %v115_v55 = vadd.f32 %v113_v48, %v109_v47  ;;  %v125_v56 = vmul.f32 %v124_v51, %v290_v4  ;;  %v120_v57 = vmul.f32 %v118_v45, %v296_v7 }
  0x28   :  { %104 = vst.msk [vmem:[#allocation7 + $0x1] ss:$4 sm:$0x3] %vm318_vm0, %v101_v50  ;;  %v116_v58 = vadd.f32 %v114_v53, %v110_v52  ;;  %v126_v59 = vmul.f32 %v124_v51, %v301_v11  ;;  %v134_v60 = vstv %s328_s29  ;;  %v138_v61 = vstv %s334_s30 }
  0x29   :  { %106 = vst.msk [vmem:[#allocation7 + $0x9] ss:$4 sm:$0x3] %vm318_vm0, %v102_v54  ;;  %v121_v62 = vadd.f32 %v119_v49, %v115_v55  ;;  %v135_v63 = vmul.f32 %v134_v60, %v280_v0  ;;  %v139_v6 = vmul.f32 %v138_v61, %v282_v1  ;;  %v144_v8 = vstv %s337_s3 }
  0x2a   :  { %v122_v9 = vadd.f32 %v120_v57, %v116_v58  ;;  %v145_v10 = vmul.f32 %v144_v8, %v284_v2  ;;  %v150_v12 = vstv %s342_s4  ;;  %v136_v13 = vmul.f32 %v134_v60, %v286_v3 }
  0x2b   :  { %v127_v14 = vadd.f32 %v125_v56, %v121_v62  ;;  %v141_v15 = vadd.f32 %v139_v6, %v135_v63  ;;  %v151_v16 = vmul.f32 %v150_v12, %v290_v4  ;;  %v140_v17 = vmul.f32 %v138_v61, %v292_v5 }
  0x2c   :  { %v128_v18 = vadd.f32 %v126_v59, %v122_v9  ;;  %v146_v19 = vmul.f32 %v144_v8, %v296_v7  ;;  %v152_v20 = vmul.f32 %v150_v12, %v301_v11 }
  0x2d   :  { %130 = vst.msk [vmem:[#allocation7 + $0x2] ss:$4 sm:$0x3] %vm318_vm0, %v127_v14  ;;  %v147_v0 = vadd.f32 %v145_v10, %v141_v15  ;;  %v142_v1 = vadd.f32 %v140_v17, %v136_v13 }
  0x2e   :  { %132 = vst.msk [vmem:[#allocation7 + $0xa] ss:$4 sm:$0x3] %vm318_vm0, %v128_v18 }
  0x2f   :  { %v153_v2 = vadd.f32 %v151_v16, %v147_v0  ;;  %v148_v3 = vadd.f32 %v146_v19, %v142_v1 }
  0x31   :  { %156 = vst.msk [vmem:[#allocation7 + $0x3] ss:$4 sm:$0x3] %vm318_vm0, %v153_v2  ;;  %v154_v4 = vadd.f32 %v152_v20, %v148_v3 }
  0x33   :  { %158 = vst.msk [vmem:[#allocation7 + $0xb] ss:$4 sm:$0x3] %vm318_vm0, %v154_v4 }
  0x34   :  { %236 = shalt.err (!%p233_p9)
}
  0x35   :  { %170 = dma.vmem_to_hbm [thread:$0]  %s165_s6, 256, %s392_s2, [#allocation4], %s253_s15, %s253_s15, %s254_s16  }
  0x36   :  { %249 = dma.done.wait [#allocation4], 256  }
  0x37   :  { %250 = vsyncadd [#allocation4], 4294967040 }
  0x38   :  { %174 = vsyncpa [#allocation3], 1 }
  0x39   :  { %175 = vsyncpa [#allocation4], 1 }
  0x3a   :  { %176 = vsyncpa [#allocation5], 1 }

</bundles_post_ra>
